<compile_context>
chip_gen: v7x
topology: tpu7x:2x2x1
jax: 0.10.0
libtpu: 0.0.40
codegen_flags: <defaults>
</compile_context>

<pallas_src>
import math

import jax
import jax.numpy as jnp
from jax.experimental import pallas as pl
from jax.experimental.pallas import tpu as pltpu  # noqa: F401  (TPU backend)
from jax.scipy.special import erf as _erf_exact

# ----- problem sizes (x is B*T*D, consistent with the module) -----
B, T, D = 2, 8, 32          # batch, tokens, h_size
HOUT = 32                   # h_out
NUM_LAYERS = 2              # Highway default
M = B * T                   # flattened row count = 16

_INV_SQRT2 = 1.0 / math.sqrt(2.0)


def _erf_approx(z):
    # Abramowitz & Stegun 7.1.26 rational approximation, |err| <= 1.5e-7.
    # TODO(synk): lax.erf has no guaranteed Mosaic lowering; this polynomial
    # (mul/add/exp/where only) matches exact erf to f32-level accuracy.
    p = 0.3275911
    a1, a2, a3, a4, a5 = (0.254829592, -0.284496736, 1.421413741,
                          -1.453152027, 1.061405429)
    s = jnp.where(z < 0.0, -1.0, 1.0)
    az = jnp.abs(z)
    t = 1.0 / (1.0 + p * az)
    poly = ((((a5 * t + a4) * t + a3) * t + a2) * t + a1) * t
    return s * (1.0 - poly * jnp.exp(-az * az))


def _gelu(x):
    # Exact (erf-based) GELU, as in the reference module's gelu().
    return x * 0.5 * (1.0 + _erf_approx(x * _INV_SQRT2))


def _sigmoid(x):
    # 1 / (1 + exp(-x)); reciprocal on the EUP slot (approx vrcp).
    return pl.reciprocal(1.0 + jnp.exp(-x), approx=True)


def highway_kernel(x_ref, w0_ref, b0_ref, w1_ref, b1_ref, wf_ref, bf_ref,
                   o_ref):
    x = x_ref[...].astype(jnp.float32)                          # [M, D]

    def layer(x, w_ref, b_ref):
        # One fused matmul: columns [:D] -> linear (H branch),
        #                   columns [D:] -> gate   (T branch).
        ht = jnp.dot(x, w_ref[...],
                     preferred_element_type=jnp.float32) + b_ref[...]  # [M, 2D]
        h = _gelu(ht[:, :D])
        t = _sigmoid(ht[:, D:])
        return t * (h - x) + x          # == t*h + (1 - t)*x

    x = layer(x, w0_ref, b0_ref)
    x = layer(x, w1_ref, b1_ref)

    out = jnp.dot(x, wf_ref[...], preferred_element_type=jnp.float32) + bf_ref[...]
    o_ref[...] = out.astype(o_ref.dtype)


@jax.jit
def highway(x, params):
    # Flatten [B, T, D] -> [M, D]; the whole problem is handled by a single
    # no-grid pallas_call with every operand as a full-array VMEM block.
    x2 = x.reshape(M, D)
    out2 = pl.pallas_call(
        highway_kernel,
        out_shape=jax.ShapeDtypeStruct((M, HOUT), jnp.float32),
    )(x2, *params)
    return out2.reshape(B, T, HOUT)


# ----------------- pure-JAX reference (PyTorch Highway semantics) -----------
def reference(x, params):
    w0, b0, w1, b1, wf, bf = params

    def gelu_exact(v):
        return v * 0.5 * (1.0 + _erf_exact(v * _INV_SQRT2))

    def layer(x, w, b):
        wl, wg = w[:, :D], w[:, D:]
        bl, bg = b[:, :D], b[:, D:]
        h = gelu_exact(x @ wl + bl)
        t = jax.nn.sigmoid(x @ wg + bg)
        return t * h + (1.0 - t) * x

    x = layer(x, w0, b0)
    x = layer(x, w1, b1)
    return x @ wf + bf


if __name__ == "__main__":
    key = jax.random.PRNGKey(0)
    ks = jax.random.split(key, 8)

    x = jax.random.normal(ks[0], (B, T, D), dtype=jnp.float32)

    ws, bs = 0.2, 0.1
    params = [
        ws * jax.random.normal(ks[1], (D, 2 * D), jnp.float32),   # layer0 fused W (linear | gate)
        bs * jax.random.normal(ks[2], (1, 2 * D), jnp.float32),   # layer0 fused b
        ws * jax.random.normal(ks[3], (D, 2 * D), jnp.float32),   # layer1 fused W
        bs * jax.random.normal(ks[4], (1, 2 * D), jnp.float32),   # layer1 fused b
        ws * jax.random.normal(ks[5], (D, HOUT), jnp.float32),    # fc W
        bs * jax.random.normal(ks[6], (1, HOUT), jnp.float32),    # fc b
    ]

    out = jax.block_until_ready(highway(x, params))
    ref = jax.block_until_ready(reference(x, params))

    assert out.shape == (B, T, HOUT)
    max_err = float(jnp.max(jnp.abs(out - ref)))
    assert jnp.allclose(out, ref, rtol=2e-2, atol=2e-2), (
        f"Pallas Highway kernel diverged from reference: max abs err = {max_err}")

    print("KERNEL_OK")
</pallas_src>

<mosaic_0001>
module attributes {stable_mosaic.version = 11 : i64} {
  func.func @highway_kernel(%arg0: memref<16x32xf32, #tpu.memory_space<vmem>>, %arg1: memref<32x64xf32, #tpu.memory_space<vmem>>, %arg2: memref<1x64xf32, #tpu.memory_space<vmem>>, %arg3: memref<32x64xf32, #tpu.memory_space<vmem>>, %arg4: memref<1x64xf32, #tpu.memory_space<vmem>>, %arg5: memref<32x32xf32, #tpu.memory_space<vmem>>, %arg6: memref<1x32xf32, #tpu.memory_space<vmem>>, %arg7: memref<16x32xf32, #tpu.memory_space<vmem>>) attributes {dimension_semantics = [], scalar_prefetch = 0 : i64, scratch_operands = 0 : i64, tpu.core_type = #tpu.core_type<tc>} {
    %c0 = arith.constant 0 : index
    %c0_0 = arith.constant 0 : index
    %0 = vector.load %arg0[%c0, %c0_0] : memref<16x32xf32, #tpu.memory_space<vmem>>, vector<16x32xf32>
    %c0_1 = arith.constant 0 : index
    %c0_2 = arith.constant 0 : index
    %1 = vector.load %arg1[%c0_1, %c0_2] : memref<32x64xf32, #tpu.memory_space<vmem>>, vector<32x64xf32>
    %cst = arith.constant dense<0.000000e+00> : vector<16x64xf32>
    %2 = tpu.matmul %0, %1, %cst {dimension_numbers = #tpu.dot_dimension_numbers<[1], [0], [0], [1], [0, 0, 1, 1], [], []>} : vector<16x32xf32>, vector<32x64xf32>, vector<16x64xf32> -> vector<16x64xf32>
    %c0_3 = arith.constant 0 : index
    %c0_4 = arith.constant 0 : index
    %3 = vector.load %arg2[%c0_3, %c0_4] : memref<1x64xf32, #tpu.memory_space<vmem>>, vector<1x64xf32>
    %4 = vector.broadcast %3 : vector<1x64xf32> to vector<16x64xf32>
    %5 = arith.addf %2, %4 : vector<16x64xf32>
    %6 = vector.extract_strided_slice %5 {offsets = [0, 0], sizes = [16, 32], strides = [1, 1]} : vector<16x64xf32> to vector<16x32xf32>
    %cst_5 = arith.constant 5.000000e-01 : f32
    %7 = vector.broadcast %cst_5 : f32 to vector<16x32xf32>
    %8 = arith.mulf %6, %7 : vector<16x32xf32>
    %cst_6 = arith.constant 0.707106769 : f32
    %9 = vector.broadcast %cst_6 : f32 to vector<16x32xf32>
    %10 = arith.mulf %6, %9 : vector<16x32xf32>
    %cst_7 = arith.constant 0.000000e+00 : f32
    %11 = vector.broadcast %cst_7 : f32 to vector<16x32xf32>
    %12 = arith.cmpf olt, %10, %11 : vector<16x32xf32>
    %cst_8 = arith.constant -1.000000e+00 : f32
    %cst_9 = arith.constant 1.000000e+00 : f32
    %13 = vector.broadcast %cst_8 : f32 to vector<16x32xf32>
    %14 = vector.broadcast %cst_9 : f32 to vector<16x32xf32>
    %15 = arith.select %12, %13, %14 : vector<16x32xi1>, vector<16x32xf32>
    %16 = math.absf %10 : vector<16x32xf32>
    %cst_10 = arith.constant 0.327591091 : f32
    %17 = vector.broadcast %cst_10 : f32 to vector<16x32xf32>
    %18 = arith.mulf %17, %16 : vector<16x32xf32>
    %cst_11 = arith.constant 1.000000e+00 : f32
    %19 = vector.broadcast %cst_11 : f32 to vector<16x32xf32>
    %20 = arith.addf %19, %18 : vector<16x32xf32>
    %cst_12 = arith.constant 1.000000e+00 : f32
    %21 = vector.broadcast %cst_12 : f32 to vector<16x32xf32>
    %22 = arith.divf %21, %20 : vector<16x32xf32>
    %cst_13 = arith.constant 1.06140542 : f32
    %23 = vector.broadcast %cst_13 : f32 to vector<16x32xf32>
    %24 = arith.mulf %23, %22 : vector<16x32xf32>
    %cst_14 = arith.constant -1.45315206 : f32
    %25 = vector.broadcast %cst_14 : f32 to vector<16x32xf32>
    %26 = arith.addf %24, %25 : vector<16x32xf32>
    %27 = arith.mulf %26, %22 : vector<16x32xf32>
    %cst_15 = arith.constant 1.42141378 : f32
    %28 = vector.broadcast %cst_15 : f32 to vector<16x32xf32>
    %29 = arith.addf %27, %28 : vector<16x32xf32>
    %30 = arith.mulf %29, %22 : vector<16x32xf32>
    %cst_16 = arith.constant -0.284496725 : f32
    %31 = vector.broadcast %cst_16 : f32 to vector<16x32xf32>
    %32 = arith.addf %30, %31 : vector<16x32xf32>
    %33 = arith.mulf %32, %22 : vector<16x32xf32>
    %cst_17 = arith.constant 0.254829586 : f32
    %34 = vector.broadcast %cst_17 : f32 to vector<16x32xf32>
    %35 = arith.addf %33, %34 : vector<16x32xf32>
    %36 = arith.mulf %35, %22 : vector<16x32xf32>
    %cst_18 = arith.constant 0.000000e+00 : f32
    %37 = vector.broadcast %cst_18 : f32 to vector<16x32xf32>
    %38 = arith.subf %37, %16 : vector<16x32xf32>
    %39 = arith.mulf %38, %16 : vector<16x32xf32>
    %40 = math.exp %39 : vector<16x32xf32>
    %41 = arith.mulf %36, %40 : vector<16x32xf32>
    %cst_19 = arith.constant 1.000000e+00 : f32
    %42 = vector.broadcast %cst_19 : f32 to vector<16x32xf32>
    %43 = arith.subf %42, %41 : vector<16x32xf32>
    %44 = arith.mulf %15, %43 : vector<16x32xf32>
    %cst_20 = arith.constant 1.000000e+00 : f32
    %45 = vector.broadcast %cst_20 : f32 to vector<16x32xf32>
    %46 = arith.addf %45, %44 : vector<16x32xf32>
    %47 = arith.mulf %8, %46 : vector<16x32xf32>
    %48 = vector.extract_strided_slice %5 {offsets = [0, 32], sizes = [16, 32], strides = [1, 1]} : vector<16x64xf32> to vector<16x32xf32>
    %cst_21 = arith.constant 0.000000e+00 : f32
    %49 = vector.broadcast %cst_21 : f32 to vector<16x32xf32>
    %50 = arith.subf %49, %48 : vector<16x32xf32>
    %51 = math.exp %50 : vector<16x32xf32>
    %cst_22 = arith.constant 1.000000e+00 : f32
    %52 = vector.broadcast %cst_22 : f32 to vector<16x32xf32>
    %53 = arith.addf %52, %51 : vector<16x32xf32>
    %54 = tpu.reciprocal %53 {approx = true} : vector<16x32xf32> -> vector<16x32xf32>
    %55 = arith.subf %47, %0 : vector<16x32xf32>
    %56 = arith.mulf %54, %55 : vector<16x32xf32>
    %57 = arith.addf %56, %0 : vector<16x32xf32>
    %c0_23 = arith.constant 0 : index
    %c0_24 = arith.constant 0 : index
    %58 = vector.load %arg3[%c0_23, %c0_24] : memref<32x64xf32, #tpu.memory_space<vmem>>, vector<32x64xf32>
    %cst_25 = arith.constant dense<0.000000e+00> : vector<16x64xf32>
    %59 = tpu.matmul %57, %58, %cst_25 {dimension_numbers = #tpu.dot_dimension_numbers<[1], [0], [0], [1], [0, 0, 1, 1], [], []>} : vector<16x32xf32>, vector<32x64xf32>, vector<16x64xf32> -> vector<16x64xf32>
    %c0_26 = arith.constant 0 : index
    %c0_27 = arith.constant 0 : index
    %60 = vector.load %arg4[%c0_26, %c0_27] : memref<1x64xf32, #tpu.memory_space<vmem>>, vector<1x64xf32>
    %61 = vector.broadcast %60 : vector<1x64xf32> to vector<16x64xf32>
    %62 = arith.addf %59, %61 : vector<16x64xf32>
    %63 = vector.extract_strided_slice %62 {offsets = [0, 0], sizes = [16, 32], strides = [1, 1]} : vector<16x64xf32> to vector<16x32xf32>
    %cst_28 = arith.constant 5.000000e-01 : f32
    %64 = vector.broadcast %cst_28 : f32 to vector<16x32xf32>
    %65 = arith.mulf %63, %64 : vector<16x32xf32>
    %cst_29 = arith.constant 0.707106769 : f32
    %66 = vector.broadcast %cst_29 : f32 to vector<16x32xf32>
    %67 = arith.mulf %63, %66 : vector<16x32xf32>
    %cst_30 = arith.constant 0.000000e+00 : f32
    %68 = vector.broadcast %cst_30 : f32 to vector<16x32xf32>
    %69 = arith.cmpf olt, %67, %68 : vector<16x32xf32>
    %cst_31 = arith.constant -1.000000e+00 : f32
    %cst_32 = arith.constant 1.000000e+00 : f32
    %70 = vector.broadcast %cst_31 : f32 to vector<16x32xf32>
    %71 = vector.broadcast %cst_32 : f32 to vector<16x32xf32>
    %72 = arith.select %69, %70, %71 : vector<16x32xi1>, vector<16x32xf32>
    %73 = math.absf %67 : vector<16x32xf32>
    %cst_33 = arith.constant 0.327591091 : f32
    %74 = vector.broadcast %cst_33 : f32 to vector<16x32xf32>
    %75 = arith.mulf %74, %73 : vector<16x32xf32>
    %cst_34 = arith.constant 1.000000e+00 : f32
    %76 = vector.broadcast %cst_34 : f32 to vector<16x32xf32>
    %77 = arith.addf %76, %75 : vector<16x32xf32>
    %cst_35 = arith.constant 1.000000e+00 : f32
    %78 = vector.broadcast %cst_35 : f32 to vector<16x32xf32>
    %79 = arith.divf %78, %77 : vector<16x32xf32>
    %cst_36 = arith.constant 1.06140542 : f32
    %80 = vector.broadcast %cst_36 : f32 to vector<16x32xf32>
    %81 = arith.mulf %80, %79 : vector<16x32xf32>
    %cst_37 = arith.constant -1.45315206 : f32
    %82 = vector.broadcast %cst_37 : f32 to vector<16x32xf32>
    %83 = arith.addf %81, %82 : vector<16x32xf32>
    %84 = arith.mulf %83, %79 : vector<16x32xf32>
    %cst_38 = arith.constant 1.42141378 : f32
    %85 = vector.broadcast %cst_38 : f32 to vector<16x32xf32>
    %86 = arith.addf %84, %85 : vector<16x32xf32>
    %87 = arith.mulf %86, %79 : vector<16x32xf32>
    %cst_39 = arith.constant -0.284496725 : f32
    %88 = vector.broadcast %cst_39 : f32 to vector<16x32xf32>
    %89 = arith.addf %87, %88 : vector<16x32xf32>
    %90 = arith.mulf %89, %79 : vector<16x32xf32>
    %cst_40 = arith.constant 0.254829586 : f32
    %91 = vector.broadcast %cst_40 : f32 to vector<16x32xf32>
    %92 = arith.addf %90, %91 : vector<16x32xf32>
    %93 = arith.mulf %92, %79 : vector<16x32xf32>
    %cst_41 = arith.constant 0.000000e+00 : f32
    %94 = vector.broadcast %cst_41 : f32 to vector<16x32xf32>
    %95 = arith.subf %94, %73 : vector<16x32xf32>
    %96 = arith.mulf %95, %73 : vector<16x32xf32>
    %97 = math.exp %96 : vector<16x32xf32>
    %98 = arith.mulf %93, %97 : vector<16x32xf32>
    %cst_42 = arith.constant 1.000000e+00 : f32
    %99 = vector.broadcast %cst_42 : f32 to vector<16x32xf32>
    %100 = arith.subf %99, %98 : vector<16x32xf32>
    %101 = arith.mulf %72, %100 : vector<16x32xf32>
    %cst_43 = arith.constant 1.000000e+00 : f32
    %102 = vector.broadcast %cst_43 : f32 to vector<16x32xf32>
    %103 = arith.addf %102, %101 : vector<16x32xf32>
    %104 = arith.mulf %65, %103 : vector<16x32xf32>
    %105 = vector.extract_strided_slice %62 {offsets = [0, 32], sizes = [16, 32], strides = [1, 1]} : vector<16x64xf32> to vector<16x32xf32>
    %cst_44 = arith.constant 0.000000e+00 : f32
    %106 = vector.broadcast %cst_44 : f32 to vector<16x32xf32>
    %107 = arith.subf %106, %105 : vector<16x32xf32>
    %108 = math.exp %107 : vector<16x32xf32>
    %cst_45 = arith.constant 1.000000e+00 : f32
    %109 = vector.broadcast %cst_45 : f32 to vector<16x32xf32>
    %110 = arith.addf %109, %108 : vector<16x32xf32>
    %111 = tpu.reciprocal %110 {approx = true} : vector<16x32xf32> -> vector<16x32xf32>
    %112 = arith.subf %104, %57 : vector<16x32xf32>
    %113 = arith.mulf %111, %112 : vector<16x32xf32>
    %114 = arith.addf %113, %57 : vector<16x32xf32>
    %c0_46 = arith.constant 0 : index
    %c0_47 = arith.constant 0 : index
    %115 = vector.load %arg5[%c0_46, %c0_47] : memref<32x32xf32, #tpu.memory_space<vmem>>, vector<32x32xf32>
    %cst_48 = arith.constant dense<0.000000e+00> : vector<16x32xf32>
    %116 = tpu.matmul %114, %115, %cst_48 {dimension_numbers = #tpu.dot_dimension_numbers<[1], [0], [0], [1], [0, 0, 1, 1], [], []>} : vector<16x32xf32>, vector<32x32xf32>, vector<16x32xf32> -> vector<16x32xf32>
    %c0_49 = arith.constant 0 : index
    %c0_50 = arith.constant 0 : index
    %117 = vector.load %arg6[%c0_49, %c0_50] : memref<1x32xf32, #tpu.memory_space<vmem>>, vector<1x32xf32>
    %118 = vector.broadcast %117 : vector<1x32xf32> to vector<16x32xf32>
    %119 = arith.addf %116, %118 : vector<16x32xf32>
    %c0_51 = arith.constant 0 : index
    %c0_52 = arith.constant 0 : index
    %120 = vector.load %arg7[%c0_51, %c0_52] : memref<16x32xf32, #tpu.memory_space<vmem>>, vector<16x32xf32>
    tpu.vector_store %arg7[%c0_51, %c0_52], %119 {strides = array<i32>} : memref<16x32xf32, #tpu.memory_space<vmem>>, vector<16x32xf32>,
    return
  }
}

</mosaic_0001>

<bundles_post_ra>
// kernel: highway.1
= control target key start
LH: loop header
LB: loop body
LE: loop exit
PB: predicated region body
PF: predicated region fallthrough
CT: control target
= control target key end

     0   :  { %12 = vsyncpa [#allocation3], 0  ;;  %s1014_s0 = inlined_call_operand.hbm [shape: f32[16,32], index: 0, kind: input, shape index: {}]   ;;  %s1015_s1 = inlined_call_operand.hbm [shape: f32[32,64], index: 1, kind: input, shape index: {}]   ;;  %s1016_s2 = inlined_call_operand.vmem [shape: f32[1,64], index: 2, kind: input, shape index: {}]   ;;  %s1017_s3 = inlined_call_operand.hbm [shape: f32[32,64], index: 3, kind: input, shape index: {}]   ;;  %s1018_s4 = inlined_call_operand.vmem [shape: f32[1,64], index: 4, kind: input, shape index: {}]   ;;  %s1019_s5 = inlined_call_operand.hbm [shape: f32[32,32], index: 5, kind: input, shape index: {}]   ;;  %s1020_s6 = inlined_call_operand.vmem [shape: f32[1,32], index: 6, kind: input, shape index: {}]   ;;  %s1021_s7 = inlined_call_operand.hbm [shape: f32[16,32], index: 7, kind: output, shape index: {}]  }
   0x1   :  { %13 = vsyncpa [#allocation6], 0 }
   0x2   :  { %14 = vsyncpa [#allocation9], 0 }
   0x3   :  { %15 = vsyncpa [#allocation4], 0  ;;  %s798_s24 = smov [#allocation5]   ;;  %s799_s26 = smov [#allocation2]  }
   0x4   :  { %s33_s25 = sshll.u32 %s798_s24, 4  ;;  %s21_s27 = sshll.u32 %s799_s26, 4  ;;  %s34_s25 = int_to_ptr.vmem [resolvable:$true] %s33_s25  ;;  %s848_s27 = int_to_ptr.vmem [resolvable:$true] %s21_s27 }
   0x5   :  { %s680_s30 = scalar_lea.hbm %s1015_s1, 512 }
   0x6   :  { %p681_p0 = scmp.ne.s32.totalorder %s1015_s1, %s680_s30  ;;  %p684_p1 = scmp.lt.u32.totalorder %s680_s30, %s1015_s1 }
   0x8   :  { %p686_p2 = pnand %p684_p1, %p681_p0 }
   0xa   :  { %689 = shalt.err (!%p686_p2)
}
   0xb   :  { %s690_s12 = scalar_lea.vmem %s34_s25, 512  ;;  %p695_p4 = scmp.lt.s32.totalorder %s34_s25, %s34_s25 }
   0xc   :  { %p691_p3 = scmp.ne.s32.totalorder %s34_s25, %s690_s12  ;;  %p696_p5 = scmp.lt.s32.totalorder %s690_s12, %s690_s12 }
   0xe   :  { %p697_p6 = por %p696_p5, %p695_p4 }
  0x10   :  { %p698_p7 = pnand %p697_p6, %p691_p3 }
  0x12   :  { %701 = shalt.err (!%p698_p7)
}
  0x13   :  { %s800_s13 = smov 128   ;;  %s801_s14 = smov 8  }
  0x14   :  { %39 = dma.hbm_to_vmem [thread:$0]  %s1015_s1, 512, %s34_s25, [#allocation6], %s800_s13, %s800_s13, %s801_s14  }
  0x15   :  { %s702_s19 = scalar_lea.hbm %s1014_s0, 256 }
  0x16   :  { %p703_p8 = scmp.ne.s32.totalorder %s1014_s0, %s702_s19  ;;  %p706_p9 = scmp.lt.u32.totalorder %s702_s19, %s1014_s0 }
  0x18   :  { %p708_p10 = pnand %p706_p9, %p703_p8 }
  0x1a   :  { %711 = shalt.err (!%p708_p10)
}
  0x1b   :  { %s712_s24 = scalar_lea.vmem %s848_s27, 256  ;;  %p717_p12 = scmp.lt.s32.totalorder %s848_s27, %s848_s27 }
  0x1c   :  { %p713_p11 = scmp.ne.s32.totalorder %s848_s27, %s712_s24  ;;  %p718_p13 = scmp.lt.s32.totalorder %s712_s24, %s712_s24 }
  0x1e   :  { %p719_p0 = por %p718_p13, %p717_p12 }
  0x20   :  { %p720_p1 = pnand %p719_p0, %p713_p11 }
  0x22   :  { %723 = shalt.err (!%p720_p1)
}
  0x23   :  { %27 = dma.hbm_to_vmem [thread:$0]  %s1014_s0, 256, %s848_s27, [#allocation3], %s800_s13, %s800_s13, %s801_s14  }
  0x24   :  { %s802_s26 = smov [#allocation7]   ;;  %s803_s29 = smov [#allocation8]  }
  0x25   :  { %s47_s28 = sshll.u32 %s802_s26, 4  ;;  %s61_s30 = sshll.u32 %s803_s29, 4  ;;  %s48_s28 = int_to_ptr.vmem [resolvable:$true] %s47_s28  ;;  %s885_s30 = int_to_ptr.vmem [resolvable:$true] %s61_s30 }
  0x26   :  { %s724_s10 = scalar_lea.hbm %s1017_s3, 512 }
  0x27   :  { %p725_p2 = scmp.ne.s32.totalorder %s1017_s3, %s724_s10  ;;  %p728_p3 = scmp.lt.u32.totalorder %s724_s10, %s1017_s3 }
  0x29   :  { %p730_p4 = pnand %p728_p3, %p725_p2 }
  0x2b   :  { %733 = shalt.err (!%p730_p4)
}
  0x2c   :  { %s734_s0 = scalar_lea.vmem %s48_s28, 512  ;;  %p739_p6 = scmp.lt.s32.totalorder %s48_s28, %s48_s28 }
  0x2d   :  { %p735_p5 = scmp.ne.s32.totalorder %s48_s28, %s734_s0  ;;  %p740_p7 = scmp.lt.s32.totalorder %s734_s0, %s734_s0 }
  0x2f   :  { %p741_p8 = por %p740_p7, %p739_p6 }
  0x31   :  { %p742_p9 = pnand %p741_p8, %p735_p5 }
  0x33   :  { %745 = shalt.err (!%p742_p9)
}
  0x34   :  { %53 = dma.hbm_to_vmem [thread:$0]  %s1017_s3, 512, %s48_s28, [#allocation6], %s800_s13, %s800_s13, %s801_s14  }
  0x35   :  { %s746_s20 = scalar_lea.hbm %s1019_s5, 512 }
  0x36   :  { %p747_p10 = scmp.ne.s32.totalorder %s1019_s5, %s746_s20  ;;  %p750_p11 = scmp.lt.u32.totalorder %s746_s20, %s1019_s5 }
  0x38   :  { %p752_p12 = pnand %p750_p11, %p747_p10 }
  0x3a   :  { %755 = shalt.err (!%p752_p12)
}
  0x3b   :  { %s756_s1 = scalar_lea.vmem %s885_s30, 512  ;;  %p761_p0 = scmp.lt.s32.totalorder %s885_s30, %s885_s30 }
  0x3c   :  { %p757_p13 = scmp.ne.s32.totalorder %s885_s30, %s756_s1  ;;  %p762_p1 = scmp.lt.s32.totalorder %s756_s1, %s756_s1 }
  0x3e   :  { %p763_p2 = por %p762_p1, %p761_p0 }
  0x40   :  { %p764_p3 = pnand %p763_p2, %p757_p13 }
  0x42   :  { %767 = shalt.err (!%p764_p3)
}
  0x43   :  { %67 = dma.hbm_to_vmem [thread:$0]  %s1019_s5, 512, %s885_s30, [#allocation9], %s800_s13, %s800_s13, %s801_s14  }
  0x44   :  { %790 = dma.done.wait [#allocation3], 256  }
  0x45   :  { %791 = vsyncadd [#allocation3], 4294967040 }
  0x46   :  { %792 = dma.done.wait [#allocation6], 1024  }
  0x47   :  { %793 = vsyncadd [#allocation6], 4294966272 }
  0x48   :  { %794 = dma.done.wait [#allocation9], 512  }
  0x49   :  { %795 = vsyncadd [#allocation9], 4294966784  ;;  %vm95_vm0 = vcmask 261120   ;;  %v84_v0 = vld [vmem:[#allocation5] sm:$0xff]  ;;  %v85_v1 = vld [vmem:[#allocation5 + $0x8] sm:$0xff]  ;;  %s804_s5 = smov 32  }
  0x4a   :  { %v86_v2 = vld [vmem:[#allocation5 + $0x10] sm:$0xff]  ;;  %v614_v3 = vpack.c.bf16 %v85_v1, %v84_v0  ;;  %v87_v4 = vld [vmem:[#allocation5 + $0x18] sm:$0xff]  ;;  %v805_v52 = vmov 1.0   ;;  %v261_v61 = vld [vmem:[#allocation7] sm:$0xff]  ;;  %s807_s9 = smov [#allocation10]  }
  0x4b   :  { %v922_v5 = vld [vmem:[#allocation2] sm:$0xff]  ;;  %v618_v6 = vpack.c.bf16 %v87_v4, %v86_v2  ;;  %v926_v7 = vld [vmem:[#allocation2 + $0x8] sm:$0xff]  ;;  %v262_v62 = vld [vmem:[#allocation7 + $0x8] sm:$0xff]  ;;  %s540_s10 = sshll.u32 %s807_s9, 4  ;;  %s541_s10 = int_to_ptr.vmem [resolvable:$true] %s540_s10 }
  0x4c   :  { %589 = vmatprep.mubr.msk.f32.mxu0 %vm95_vm0, %v922_v5  ;;  %615 = vmatprep.subr.bf16.mxu0 %v614_v3  ;;  %v554_v8 = vld [vmem:[%s1016_s2] ss:$0 sm:$0xff]  ;;  %v622_v1 = vpack.c.bf16 %v262_v62, %v261_v61  ;;  %s806_s2 = smov 96   ;;  %s768_s11 = scalar_lea.vmem %s541_s10, 256 }
  0x4d   :  { %617 = vmatpush3.bf16.msra.mxu0 %v614_v3  ;;  %253 = vrot.lane.b32.xlu1 %v922_v5, %s804_s5  ;;  %p769_p4 = scmp.ne.s32.totalorder %s541_s10, %s768_s11  ;;  %p773_p5 = scmp.lt.s32.totalorder %s541_s10, %s541_s10 }
  0x4e   :  { %619 = vmatprep.subr.bf16.mxu0 %v618_v6  ;;  %623 = vmatprep.subr.bf16.mxu1 %v622_v1  ;;  %p774_p6 = scmp.lt.s32.totalorder %s768_s11, %s768_s11 }
  0x4f   :  { %625 = vmatpush3.bf16.msra.mxu1 %v622_v1 }
  0x50   :  { %p775_p7 = por %p774_p6, %p773_p5 }
  0x51   :  { %621 = vmatpush3.bf16.msra.mxu0 %v618_v6  ;;  %255 = vrot.lane.b32.xlu1 %v926_v7, %s804_s5 }
  0x52   :  { %p776_p8 = pnand %p775_p7, %p769_p4 }
  0x54   :  { %590 = vmatmul.mubr.msk.f32.vlgmr.msra.gmra.mrb[0].mxu0 %vm95_vm0, %v926_v7 }
 0x127   :  { %v591_v9 = vpop.f32.mrb[0].mxu0 }
 0x128   :  { %v937_v10 = vadd.f32 %v591_v9, %v554_v8  ;;  %v168_v11 = vpop.f32.mrb[1].mxu0 }
 0x129   :  { %v939_v12 = vadd.f32 %v554_v8, %v168_v11 }
 0x12a   :  { %v180_v13 = vmul.f32 0.70710677, %v937_v10  ;;  %v178_v63 = vmul.f32 0.5, %v937_v10  ;;  %v232_v8 = vsub.f32 0.0, %v937_v10 }
 0x12b   :  { %v179_v14 = vmul.f32 0.70710677, %v939_v12  ;;  %v177_v58 = vmul.f32 0.5, %v939_v12  ;;  %v231_v6 = vsub.f32 0.0, %v939_v12 }
 0x12c   :  { %v186_v15 = vand.u32 2147483647, %v180_v13  ;;  %vm182_vm1 = vcmp.lt.f32.partialorder %v180_v13, 0.0  ;;  %v235_v11 = vmul.f32 1.442695, %v232_v8 }
 0x12d   :  { %v185_v16 = vand.u32 2147483647, %v179_v14  ;;  %vm181_vm2 = vcmp.lt.f32.partialorder %v179_v14, 0.0  ;;  %v184_v53 = vsel %vm182_vm1, -1.0, %v805_v52  ;;  %v233_v9 = vmul.f32 1.442695, %v231_v6 }
 0x12e   :  { %v188_v17 = vmul.f32 0.3275911, %v186_v15  ;;  %v214_v21 = vsub.f32 0.0, %v186_v15  ;;  %v183_v55 = vsel %vm181_vm2, -1.0, %v805_v52 }
 0x12f   :  { %v187_v18 = vmul.f32 0.3275911, %v185_v16  ;;  %v213_v22 = vsub.f32 0.0, %v185_v16 }
 0x130   :  { %v190_v19 = vadd.f32 1.0, %v188_v17  ;;  %v216_v24 = vmul.f32 %v214_v21, %v186_v15  ;;  %v263_v15 = vld [vmem:[#allocation7 + $0x10] sm:$0xff] }
 0x131   :  { %v189_v20 = vadd.f32 1.0, %v187_v18  ;;  %v215_v26 = vmul.f32 %v213_v22, %v185_v16  ;;  %v264_v16 = vld [vmem:[#allocation7 + $0x18] sm:$0xff] }
 0x132   :  { %648 = vrcp.f32 %v190_v19  ;;  %v219_v30 = vmul.f32 1.442695, %v216_v24  ;;  %v626_v18 = vpack.c.bf16 %v264_v16, %v263_v15  ;;  %v437_v16 = vld [vmem:[#allocation8] sm:$0xff] }
 0x133   :  { %650 = vrcp.f32 %v189_v20  ;;  %v217_v32 = vmul.f32 1.442695, %v215_v26 }
 0x134   :  { %652 = vpow2.f32 %v219_v30  ;;  %627 = vmatprep.subr.bf16.mxu1 %v626_v18 }
 0x135   :  { %654 = vpow2.f32 %v217_v32  ;;  %629 = vmatpush3.bf16.msra.mxu1 %v626_v18  ;;  %v439_v18 = vld [vmem:[#allocation8 + $0x10] sm:$0xff] }
 0x136   :  { %656 = vpow2.f32 %v233_v9 }
 0x137   :  { %658 = vpow2.f32 %v235_v11 }
 0x13c   :  { %v649_v23 = vpop.eup %648 }
 0x13d   :  { %v651_v25 = vpop.eup %650  ;;  %v196_v27 = vmul.f32 1.0614054, %v649_v23 }
 0x13e   :  { %v195_v28 = vmul.f32 1.0614054, %v651_v25  ;;  %v653_v46 = vpop.eup %652 }
 0x13f   :  { %v198_v29 = vadd.f32 -1.4531521, %v196_v27  ;;  %v655_v48 = vpop.eup %654 }
 0x140   :  { %v197_v31 = vadd.f32 -1.4531521, %v195_v28  ;;  %v657_v13 = vpop.eup %656  ;;  %v557_v28 = vld [vmem:[%s1018_s4] ss:$0 sm:$0xff] }
 0x141   :  { %v200_v33 = vmul.f32 %v649_v23, %v198_v29  ;;  %v237_v14 = vadd.f32 1.0, %v657_v13 }
 0x142   :  { %v199_v34 = vmul.f32 %v651_v25, %v197_v31 }
 0x143   :  { %v202_v35 = vadd.f32 1.4214138, %v200_v33  ;;  %660 = vrcp.f32 %v237_v14 }
 0x144   :  { %v201_v36 = vadd.f32 1.4214138, %v199_v34 }
 0x145   :  { %v204_v37 = vmul.f32 %v649_v23, %v202_v35 }
 0x146   :  { %v203_v38 = vmul.f32 %v651_v25, %v201_v36 }
 0x147   :  { %v206_v39 = vadd.f32 -0.28449672, %v204_v37 }
 0x148   :  { %v205_v40 = vadd.f32 -0.28449672, %v203_v38 }
 0x149   :  { %v208_v41 = vmul.f32 %v649_v23, %v206_v39 }
 0x14a   :  { %v207_v42 = vmul.f32 %v651_v25, %v205_v40 }
 0x14b   :  { %v210_v43 = vadd.f32 0.2548296, %v208_v41 }
 0x14c   :  { %v209_v44 = vadd.f32 0.2548296, %v207_v42 }
 0x14d   :  { %v212_v45 = vmul.f32 %v649_v23, %v210_v43 }
 0x14e   :  { %v211_v47 = vmul.f32 %v651_v25, %v209_v44 }
 0x14f   :  { %v222_v49 = vmul.f32 %v653_v46, %v212_v45 }
 0x150   :  { %v221_v50 = vmul.f32 %v655_v48, %v211_v47 }
 0x151   :  { %v224_v51 = vsub.f32 1.0, %v222_v49 }
 0x152   :  { %v223_v54 = vsub.f32 1.0, %v221_v50 }
 0x153   :  { %v226_v56 = vmul.f32 %v224_v51, %v184_v53 }
 0x154   :  { %v225_v57 = vmul.f32 %v223_v54, %v183_v55 }
 0x155   :  { %v228_v60 = vadd.f32 1.0, %v226_v56 }
 0x156   :  { %v227_v59 = vadd.f32 1.0, %v225_v57 }
 0x157   :  { %v230_v3 = vmul.f32 %v228_v60, %v178_v63 }
 0x158   :  { %v229_v0 = vmul.f32 %v227_v59, %v177_v58 }
 0x159   :  { %v242_v4 = vsub.f32 %v230_v3, %v926_v7  ;;  %v254_v7 = vpop.permute.xlu1 %253 }
 0x15a   :  { %v241_v2 = vsub.f32 %v229_v0, %v922_v5  ;;  %v659_v5 = vpop.eup %658 }
 0x15b   :  { %v238_v17 = vadd.f32 1.0, %v659_v5  ;;  %v661_v19 = vpop.eup %660 }
 0x15c   :  { %245 = vrot.lane.b32.xlu0 %v241_v2, %s804_s5 }
 0x15d   :  { %662 = vrcp.f32 %v238_v17  ;;  %v256_v23 = vpop.permute.xlu1 %255  ;;  %v438_v17 = vld [vmem:[#allocation8 + $0x8] sm:$0xff] }
 0x160   :  { %247 = vrot.lane.b32.xlu0 %v242_v4, %s804_s5 }
 0x167   :  { %v663_v21 = vpop.eup %662 }
 0x1ce   :  { %v246_v12 = vpop.permute.xlu0 %245 }
 0x1cf   :  { %v251_v20 = vmul.f32 %v661_v19, %v246_v12  ;;  %v630_v19 = vpack.c.bf16 %v438_v17, %v437_v16  ;;  %v440_v12 = vld [vmem:[#allocation8 + $0x18] sm:$0xff] }
 0x1d1   :  { %v953_v10 = vadd.f32 %v254_v7, %v251_v20  ;;  %631 = vmatprep.subr.bf16.mxu0 %v630_v19 }
 0x1d2   :  { %v248_v22 = vpop.permute.xlu0 %247  ;;  %633 = vmatpush3.bf16.msra.mxu0 %v630_v19 }
 0x1d3   :  { %v252_v24 = vmul.f32 %v663_v21, %v248_v22  ;;  %274 = vrot.lane.b32.xlu0 %v953_v10, %s806_s2  ;;  %v634_v22 = vpack.c.bf16 %v440_v12, %v439_v18 }
 0x1d5   :  { %v957_v25 = vadd.f32 %v256_v23, %v252_v24  ;;  %635 = vmatprep.subr.bf16.mxu0 %v634_v22 }
 0x1d6   :  { %637 = vmatpush3.bf16.msra.mxu0 %v634_v22 }
 0x1d7   :  { %276 = vrot.lane.b32.xlu1 %v957_v25, %s806_s2 }
 0x245   :  { %v961_v26 = vpop.permute.xlu0 %274 }
 0x246   :  { %600 = vmatprep.mubr.msk.f32.mxu1 %vm95_vm0, %v961_v26 }
 0x249   :  { %v965_v27 = vpop.permute.xlu1 %276 }
 0x24a   :  { %601 = vmatmul.mubr.msk.f32.vlgmr.msra.gmra.mrb[0].mxu1 %vm95_vm0, %v965_v27 }
 0x31d   :  { %v602_v29 = vpop.f32.mrb[0].mxu1 }
 0x31e   :  { %v972_v30 = vadd.f32 %v602_v29, %v557_v28  ;;  %v348_v31 = vpop.f32.mrb[1].mxu1 }
 0x31f   :  { %v974_v32 = vadd.f32 %v557_v28, %v348_v31 }
 0x320   :  { %v360_v33 = vmul.f32 0.70710677, %v972_v30  ;;  %v358_v20 = vmul.f32 0.5, %v972_v30 }
 0x321   :  { %v359_v34 = vmul.f32 0.70710677, %v974_v32  ;;  %v357_v23 = vmul.f32 0.5, %v974_v32 }
 0x322   :  { %v366_v35 = vand.u32 2147483647, %v360_v33  ;;  %vm362_vm3 = vcmp.lt.f32.partialorder %v360_v33, 0.0  ;;  %v412_v33 = vsub.f32 0.0, %v972_v30 }
 0x323   :  { %v365_v36 = vand.u32 2147483647, %v359_v34  ;;  %vm361_vm4 = vcmp.lt.f32.partialorder %v359_v34, 0.0  ;;  %v364_v13 = vsel %vm362_vm3, -1.0, %v805_v52  ;;  %v411_v34 = vsub.f32 0.0, %v974_v32 }
 0x324   :  { %v368_v37 = vmul.f32 0.3275911, %v366_v35  ;;  %v394_v41 = vsub.f32 0.0, %v366_v35  ;;  %v363_v5 = vsel %vm361_vm4, -1.0, %v805_v52 }
 0x325   :  { %v367_v38 = vmul.f32 0.3275911, %v365_v36  ;;  %v393_v42 = vsub.f32 0.0, %v365_v36 }
 0x326   :  { %v370_v39 = vadd.f32 1.0, %v368_v37  ;;  %v396_v44 = vmul.f32 %v394_v41, %v366_v35  ;;  %v415_v35 = vmul.f32 1.442695, %v412_v33 }
 0x327   :  { %v369_v40 = vadd.f32 1.0, %v367_v38  ;;  %v395_v46 = vmul.f32 %v393_v42, %v365_v36  ;;  %v413_v36 = vmul.f32 1.442695, %v411_v34 }
 0x328   :  { %664 = vrcp.f32 %v370_v39  ;;  %v399_v50 = vmul.f32 1.442695, %v396_v44 }
 0x329   :  { %666 = vrcp.f32 %v369_v40  ;;  %v397_v53 = vmul.f32 1.442695, %v395_v46 }
 0x32a   :  { %668 = vpow2.f32 %v399_v50 }
 0x32b   :  { %670 = vpow2.f32 %v397_v53 }
 0x32c   :  { %672 = vpow2.f32 %v415_v35 }
 0x32d   :  { %674 = vpow2.f32 %v413_v36 }
 0x332   :  { %v665_v43 = vpop.eup %664 }
 0x333   :  { %v667_v45 = vpop.eup %666  ;;  %v376_v47 = vmul.f32 1.0614054, %v665_v43 }
 0x334   :  { %v375_v48 = vmul.f32 1.0614054, %v667_v45  ;;  %v669_v3 = vpop.eup %668 }
 0x335   :  { %v378_v49 = vadd.f32 -1.4531521, %v376_v47  ;;  %v671_v6 = vpop.eup %670  ;;  %v560_v47 = vld [vmem:[%s1020_s6] ss:$0 sm:$0xff] }
 0x336   :  { %v377_v51 = vadd.f32 -1.4531521, %v375_v48  ;;  %v673_v37 = vpop.eup %672 }
 0x337   :  { %v380_v54 = vmul.f32 %v665_v43, %v378_v49  ;;  %v675_v38 = vpop.eup %674  ;;  %v418_v39 = vadd.f32 1.0, %v673_v37 }
 0x338   :  { %v379_v55 = vmul.f32 %v667_v45, %v377_v51  ;;  %v417_v40 = vadd.f32 1.0, %v675_v38 }
 0x339   :  { %v382_v56 = vadd.f32 1.4214138, %v380_v54  ;;  %676 = vrcp.f32 %v418_v39 }
 0x33a   :  { %v381_v57 = vadd.f32 1.4214138, %v379_v55  ;;  %678 = vrcp.f32 %v417_v40 }
 0x33b   :  { %v384_v58 = vmul.f32 %v665_v43, %v382_v56 }
 0x33c   :  { %v383_v59 = vmul.f32 %v667_v45, %v381_v57 }
 0x33d   :  { %v386_v60 = vadd.f32 -0.28449672, %v384_v58 }
 0x33e   :  { %v385_v61 = vadd.f32 -0.28449672, %v383_v59 }
 0x33f   :  { %v388_v62 = vmul.f32 %v665_v43, %v386_v60 }
 0x340   :  { %v387_v63 = vmul.f32 %v667_v45, %v385_v61 }
 0x341   :  { %v390_v0 = vadd.f32 0.2548296, %v388_v62 }
 0x342   :  { %v389_v1 = vadd.f32 0.2548296, %v387_v63 }
 0x343   :  { %v392_v2 = vmul.f32 %v665_v43, %v390_v0 }
 0x344   :  { %v391_v4 = vmul.f32 %v667_v45, %v389_v1 }
 0x345   :  { %v402_v8 = vmul.f32 %v669_v3, %v392_v2 }
 0x346   :  { %v401_v9 = vmul.f32 %v671_v6, %v391_v4 }
 0x347   :  { %v404_v11 = vsub.f32 1.0, %v402_v8 }
 0x348   :  { %v403_v14 = vsub.f32 1.0, %v401_v9 }
 0x349   :  { %v406_v15 = vmul.f32 %v404_v11, %v364_v13 }
 0x34a   :  { %v405_v7 = vmul.f32 %v403_v14, %v363_v5 }
 0x34b   :  { %v408_v21 = vadd.f32 1.0, %v406_v15 }
 0x34c   :  { %v407_v24 = vadd.f32 1.0, %v405_v7 }
 0x34d   :  { %v410_v28 = vmul.f32 %v408_v21, %v358_v20 }
 0x34e   :  { %v409_v29 = vmul.f32 %v407_v24, %v357_v23 }
 0x34f   :  { %v424_v52 = vsub.f32 %v410_v28, %v965_v27 }
 0x350   :  { %v423_v31 = vsub.f32 %v409_v29, %v961_v26  ;;  %v677_v26 = vpop.eup %676 }
 0x351   :  { %429 = vrot.lane.b32.xlu1 %v424_v52, %s804_s5  ;;  %v679_v41 = vpop.eup %678 }
 0x352   :  { %427 = vrot.lane.b32.xlu0 %v423_v31, %s804_s5 }
 0x3c3   :  { %v430_v27 = vpop.permute.xlu1 %429 }
 0x3c4   :  { %v434_v42 = vmul.f32 %v677_v26, %v430_v27  ;;  %v428_v43 = vpop.permute.xlu0 %427 }
 0x3c5   :  { %v433_v44 = vmul.f32 %v679_v41, %v428_v43 }
 0x3c6   :  { %v436_v30 = vadd.f32 %v434_v42, %v957_v25 }
 0x3c7   :  { %v435_v32 = vadd.f32 %v433_v44, %v953_v10 }
 0x3c8   :  { %452 = vrot.lane.b32.xlu1 %v436_v30, %s806_s2 }
 0x3c9   :  { %450 = vrot.lane.b32.xlu0 %v435_v32, %s806_s2 }
 0x43a   :  { %v453_v46 = vpop.permute.xlu1 %452 }
 0x43b   :  { %v451_v45 = vpop.permute.xlu0 %450 }
 0x43c   :  { %611 = vmatprep.mubr.msk.f32.mxu0 %vm95_vm0, %v451_v45 }
 0x43d   :  { %612 = vmatmul.mubr.msk.f32.vlgmr.msra.gmra.mrb[2].mxu0 %vm95_vm0, %v453_v46 }
 0x510   :  { %v613_v48 = vpop.f32.mrb[2].mxu0 }
 0x511   :  { %v530_v25 = vadd.f32 %v613_v48, %v560_v47  ;;  %v524_v49 = vpop.f32.mrb[3].mxu0 }
 0x512   :  { %v525_v10 = vadd.f32 %v560_v47, %v524_v49 }
 0x513   :  { %534 = vst.msk [vmem:[#allocation10 + $0x8] sm:$0xff] %vm95_vm0, %v530_v25 }
 0x514   :  { %533 = vst.msk [vmem:[#allocation10] sm:$0xff] %vm95_vm0, %v525_v10 }
 0x515   :  { %779 = shalt.err (!%p776_p8)
}
 0x516   :  { %s780_s15 = scalar_lea.hbm %s1021_s7, 256 }
 0x517   :  { %p781_p9 = scmp.ne.s32.totalorder %s1021_s7, %s780_s15  ;;  %p784_p10 = scmp.lt.u32.totalorder %s780_s15, %s1021_s7 }
 0x519   :  { %p786_p11 = pnand %p784_p10, %p781_p9 }
 0x51b   :  { %789 = shalt.err (!%p786_p11)
}
 0x51c   :  { %546 = dma.vmem_to_hbm [thread:$0]  %s541_s10, 256, %s1021_s7, [#allocation4], %s800_s13, %s800_s13, %s801_s14  }
 0x51d   :  { %796 = dma.done.wait [#allocation4], 256  }
 0x51e   :  { %797 = vsyncadd [#allocation4], 4294967040 }
 0x51f   :  { %550 = vsyncpa [#allocation3], 1 }
 0x520   :  { %551 = vsyncpa [#allocation6], 1 }
 0x521   :  { %552 = vsyncpa [#allocation9], 1 }
 0x522   :  { %553 = vsyncpa [#allocation4], 1 }

</bundles_post_ra>
